<compile_context>
chip_gen: v5e
topology: v5e:2x2
jax: 0.10.0
libtpu: 0.0.40
codegen_flags: <defaults>
</compile_context>

<pallas_src>
import math

import jax
import jax.numpy as jnp
from jax import lax
from jax.experimental import pallas as pl
from jax.experimental.pallas import tpu as pltpu

_LANE = 128
_SUBLANE = 8


def _round_up(a, b):
    return (a + b - 1) // b * b


def _make_l2net_kernel(kk, num_k, n_rem, tn):
    ragged = n_rem != tn  # last lane-tile is partial -> mask it in-kernel

    def kernel(p_ref, x_ref, o_ref):
        # p_ref: (1,)        l2_penalty in SMEM
        # x_ref: (bt, tn)    input tile in VMEM (auto double-buffered)
        # o_ref: (1, bt, 1)  per-(split, batch-block) output, resident over k
        s = pl.program_id(1)
        k = pl.program_id(2)
        t = s * kk + k  # global lane-tile index

        @pl.when(k == 0)
        def _init():
            o_ref[...] = jnp.zeros_like(o_ref)

        def _accum(xt):
            # per-row partial sums: VPU squares/adds + one XLU lane reduce
            o_ref[...] += jnp.sum(xt * xt, axis=1, keepdims=True)[None]

        if ragged:
            @pl.when(t < num_k - 1)
            def _full():
                _accum(x_ref[...].astype(jnp.float32))

            @pl.when(t == num_k - 1)
            def _tail():
                xt = x_ref[...].astype(jnp.float32)
                lane = lax.broadcasted_iota(jnp.int32, xt.shape, 1)
                _accum(jnp.where(lane < n_rem, xt, 0.0))
        else:
            _accum(x_ref[...].astype(jnp.float32))

        @pl.when(k == kk - 1)
        def _finalize():
            p = p_ref[0].astype(jnp.float32)
            pv = jnp.full((1, 1, 1), p, dtype=jnp.float32)
            # softplus(p) = logaddexp(0, p), numerically stable.
            scale = jnp.logaddexp(jnp.zeros((1, 1, 1), jnp.float32), pv)
            o_ref[...] = o_ref[...] * scale

    return kernel


def l2net_forward(x, l2_penalty, *, target_tile_bytes=4 << 20):
    """x: (B, ...) float array; l2_penalty: (1,) float32. Returns (B, 1) f32."""
    B = x.shape[0]
    N = math.prod(x.shape[1:])
    x2 = x.reshape(B, N)  # flatten only; no pad / no extra HBM copy for padding
    itemsize = jnp.dtype(x2.dtype).itemsize

    # ---- tile selection --------------------------------------------------
    # bt: batch rows per tile (multiple of 8, or == B); tn: lanes per tile
    # (multiple of 128, or == N).  One (sublane-padded) input buffer targets
    # ~target_tile_bytes; double-buffered this stays well under the scoped
    # VMEM limit on every TPU generation.
    if B <= _SUBLANE:
        bt = B
    else:
        row_bytes = _round_up(N, _LANE) * itemsize
        bt_want = _round_up(max(1, target_tile_bytes // row_bytes), _SUBLANE)
        bt = B if bt_want >= B else min(bt_want, 1024)
    num_b = pl.cdiv(B, bt)

    bt_pad = _round_up(bt, _SUBLANE)  # VMEM sublane padding of a tile
    tn_want = _round_up(max(1, target_tile_bytes // (bt_pad * itemsize)), _LANE)
    if tn_want >= N:
        tn, num_k = N, 1
    else:
        tn, num_k = tn_want, pl.cdiv(N, tn_want)
    n_rem = N - (num_k - 1) * tn  # lanes in the last (possibly ragged) tile

    # Split the reduction axis in two when the batch axis alone cannot feed a
    # second TensorCore (v7x megacore); scaled partials are summed outside.
    # (Only when num_k is even, so no dead grid steps are needed.)
    num_s = 2 if (num_b == 1 and num_k >= 2 and num_k % 2 == 0) else 1
    kk = num_k // num_s

    p = jnp.asarray(l2_penalty, jnp.float32).reshape(1)
    kernel = _make_l2net_kernel(kk, num_k, n_rem, tn)

    out = pl.pallas_call(
        kernel,
        out_shape=jax.ShapeDtypeStruct((num_s, B, 1), jnp.float32),
        grid_spec=pltpu.PrefetchScalarGridSpec(
            num_scalar_prefetch=0,
            grid=(num_b, num_s, kk),
            in_specs=[
                # scalar l2_penalty lives in SMEM (no padded VMEM tile)
                pl.BlockSpec(memory_space=pltpu.MemorySpace.SMEM),
                # un-padded (bt, tn) input tiles, double-buffered by Pallas
                pl.BlockSpec((bt, tn), lambda b, s, k: (b, s * kk + k)),
            ],
            # output block stays resident across the k (reduction) axis
            out_specs=pl.BlockSpec((1, bt, 1), lambda b, s, k: (s, b, 0)),
        ),
        compiler_params=pltpu.CompilerParams(
            dimension_semantics=("parallel", "parallel", "arbitrary"),
            vmem_limit_bytes=32 << 20,
        ),
        cost_estimate=pl.CostEstimate(
            flops=2 * B * N,
            transcendentals=2 * num_b * num_s,
            bytes_accessed=B * N * itemsize + num_s * B * 4 + 4,
        ),
    )(p, x2)
    # Combine the (at most 2) scaled partial sums per batch element.
    return out.sum(axis=0)


def l2net_reference(x, l2_penalty):
    B = x.shape[0]
    l2_term = jnp.sum(x.reshape(B, -1).astype(jnp.float32) ** 2, axis=1)
    return (jax.nn.softplus(l2_penalty[0]) * l2_term).reshape(B, -1)


if __name__ == "__main__":
    key = jax.random.PRNGKey(0)

    # Deterministic parameter init matching nn.Parameter(-9.0 * torch.ones(1))
    l2_penalty = -9.0 * jnp.ones((1,), dtype=jnp.float32)

    # Primary case: typical small image input for this module.
    B, C, H, W = 2, 4, 16, 16
    x = jax.random.normal(key, (B, C, H, W), dtype=jnp.float32)
    out = jax.block_until_ready(l2net_forward(x, l2_penalty))
    ref = l2net_reference(x, l2_penalty)
    assert out.shape == (B, 1), out.shape
    assert jnp.allclose(out, ref, rtol=1e-5, atol=1e-5), (out, ref)

    # Secondary case: feature count not divisible by the lane tile exercises
    # the no-pad ragged-tail masking and the 2-way reduction-axis split.
    x2 = jax.random.normal(jax.random.PRNGKey(1), (2, 4, 25, 30), dtype=jnp.float32)
    out2 = jax.block_until_ready(
        l2net_forward(x2, l2_penalty, target_tile_bytes=64 << 10))
    ref2 = l2net_reference(x2, l2_penalty)
    assert out2.shape == (2, 1), out2.shape
    assert jnp.allclose(out2, ref2, rtol=1e-5, atol=1e-5), (out2, ref2)

    print("KERNEL_OK")
</pallas_src>

<mosaic_0001>
module attributes {stable_mosaic.version = 11 : i64} {
  func.func @kernel(%arg0: i32, %arg1: i32, %arg2: i32, %arg3: memref<1xf32, #tpu.memory_space<smem>>, %arg4: memref<2x1024xf32, #tpu.memory_space<vmem>>, %arg5: memref<1x2x1xf32, #tpu.memory_space<vmem>>) attributes {dimension_semantics = [#tpu.dimension_semantics<parallel>, #tpu.dimension_semantics<parallel>, #tpu.dimension_semantics<arbitrary>], iteration_bounds = array<i64: 1, 1, 1>, scalar_prefetch = 0 : i64, scratch_operands = 0 : i64, tpu.core_type = #tpu.core_type<tc>, window_params = [{transform_indices = @transform_0, window_bounds = array<i64: 1>}, {transform_indices = @transform_1, window_bounds = array<i64: 2, 1024>}, {transform_indices = @transform_2, window_bounds = array<i64: 1, 2, 1>}]} {
    %c0_i32 = arith.constant 0 : i32
    %0 = arith.cmpi eq, %arg2, %c0_i32 : i32
    %1 = arith.extui %0 : i1 to i32
    %c0_i32_0 = arith.constant 0 : i32
    %2 = arith.cmpi ne, %1, %c0_i32_0 : i32
    scf.if %2 {
      %cst_10 = arith.constant 0.000000e+00 : f32
      %14 = vector.broadcast %cst_10 : f32 to vector<1x2x1xf32>
      %c0_11 = arith.constant 0 : index
      %c0_12 = arith.constant 0 : index
      %c0_13 = arith.constant 0 : index
      %15 = vector.load %arg5[%c0_11, %c0_12, %c0_13] : memref<1x2x1xf32, #tpu.memory_space<vmem>>, vector<1x2x1xf32>
      tpu.vector_store %arg5[%c0_11, %c0_12, %c0_13], %14 {strides = array<i32>} : memref<1x2x1xf32, #tpu.memory_space<vmem>>, vector<1x2x1xf32>,
    } else {
    }
    %c0 = arith.constant 0 : index
    %c0_1 = arith.constant 0 : index
    %3 = vector.load %arg4[%c0, %c0_1] : memref<2x1024xf32, #tpu.memory_space<vmem>>, vector<2x1024xf32>
    %c0_2 = arith.constant 0 : index
    %c0_3 = arith.constant 0 : index
    %c0_4 = arith.constant 0 : index
    %4 = vector.load %arg5[%c0_2, %c0_3, %c0_4] : memref<1x2x1xf32, #tpu.memory_space<vmem>>, vector<1x2x1xf32>
    %5 = arith.mulf %3, %3 : vector<2x1024xf32>
    %cst = arith.constant dense<0.000000e+00> : vector<2xf32>
    %6 = vector.multi_reduction <add>, %5, %cst [1] : vector<2x1024xf32> to vector<2xf32>
    %7 = vector.shape_cast %6 : vector<2xf32> to vector<2x1xf32>
    %8 = vector.shape_cast %7 : vector<2x1xf32> to vector<1x2x1xf32>
    %9 = arith.addf %4, %8 : vector<1x2x1xf32>
    %c0_5 = arith.constant 0 : index
    %c0_6 = arith.constant 0 : index
    %c0_7 = arith.constant 0 : index
    %10 = vector.load %arg5[%c0_5, %c0_6, %c0_7] : memref<1x2x1xf32, #tpu.memory_space<vmem>>, vector<1x2x1xf32>
    tpu.vector_store %arg5[%c0_5, %c0_6, %c0_7], %9 {strides = array<i32>} : memref<1x2x1xf32, #tpu.memory_space<vmem>>, vector<1x2x1xf32>,
    %c0_i32_8 = arith.constant 0 : i32
    %11 = arith.cmpi eq, %arg2, %c0_i32_8 : i32
    %12 = arith.extui %11 : i1 to i32
    %c0_i32_9 = arith.constant 0 : i32
    %13 = arith.cmpi ne, %12, %c0_i32_9 : i32
    scf.if %13 {
      %c0_10 = arith.constant 0 : index
      %14 = memref.load %arg3[%c0_10] : memref<1xf32, #tpu.memory_space<smem>>
      %15 = vector.broadcast %14 : f32 to vector<1x1x1xf32>
      %cst_11 = arith.constant 0.000000e+00 : f32
      %16 = vector.broadcast %cst_11 : f32 to vector<1x1x1xf32>
      %17 = arith.maximumf %16, %15 : vector<1x1x1xf32>
      %18 = arith.subf %16, %15 : vector<1x1x1xf32>
      %19 = arith.cmpf one, %18, %18 : vector<1x1x1xf32>
      %20 = arith.addf %16, %15 : vector<1x1x1xf32>
      %21 = math.absf %18 : vector<1x1x1xf32>
      %cst_12 = arith.constant 0.000000e+00 : f32
      %22 = vector.broadcast %cst_12 : f32 to vector<1x1x1xf32>
      %23 = arith.subf %22, %21 : vector<1x1x1xf32>
      %24 = math.exp %23 : vector<1x1x1xf32>
      %25 = math.log1p %24 : vector<1x1x1xf32>
      %26 = arith.addf %17, %25 : vector<1x1x1xf32>
      %27 = arith.select %19, %20, %26 : vector<1x1x1xi1>, vector<1x1x1xf32>
      %c0_13 = arith.constant 0 : index
      %c0_14 = arith.constant 0 : index
      %c0_15 = arith.constant 0 : index
      %28 = vector.load %arg5[%c0_13, %c0_14, %c0_15] : memref<1x2x1xf32, #tpu.memory_space<vmem>>, vector<1x2x1xf32>
      %29 = vector.broadcast %27 : vector<1x1x1xf32> to vector<1x2x1xf32>
      %30 = arith.mulf %28, %29 : vector<1x2x1xf32>
      %c0_16 = arith.constant 0 : index
      %c0_17 = arith.constant 0 : index
      %c0_18 = arith.constant 0 : index
      %31 = vector.load %arg5[%c0_16, %c0_17, %c0_18] : memref<1x2x1xf32, #tpu.memory_space<vmem>>, vector<1x2x1xf32>
      tpu.vector_store %arg5[%c0_16, %c0_17, %c0_18], %30 {strides = array<i32>} : memref<1x2x1xf32, #tpu.memory_space<vmem>>, vector<1x2x1xf32>,
    } else {
    }
    return
  }
  func.func @transform_0(%arg0: i32, %arg1: i32, %arg2: i32) -> i32 {
    %c0_i32 = arith.constant 0 : i32
    %c0_i32_0 = arith.constant 0 : i32
    return %c0_i32 : i32
  }
  func.func @transform_1(%arg0: i32, %arg1: i32, %arg2: i32) -> (i32, i32) {
    %c1_i32 = arith.constant 1 : i32
    %0 = arith.muli %arg1, %c1_i32 : i32
    %1 = arith.addi %0, %arg2 : i32
    %c0_i32 = arith.constant 0 : i32
    return %arg0, %1 : i32, i32
  }
  func.func @transform_2(%arg0: i32, %arg1: i32, %arg2: i32) -> (i32, i32, i32) {
    %c0_i32 = arith.constant 0 : i32
    %c0_i32_0 = arith.constant 0 : i32
    return %arg1, %arg0, %c0_i32 : i32, i32, i32
  }
}

</mosaic_0001>

<bundles_post_ra>
// kernel: tpu_custom_call.1
= control target key start
LH: loop header
LB: loop body
LE: loop exit
PB: predicated region body
PF: predicated region fallthrough
CT: control target
= control target key end

     0   :  { %8 = vsyncpa [#allocation4], 0  ;;  %s149_s12 = smov [#allocation3]   ;;  %s198_s0 = inlined_call_operand.<no memory space> [shape: f32[1], index: 0, kind: input, shape index: {}]   ;;  %s199_s1 = inlined_call_operand.hbm [shape: f32[2,1024], index: 1, kind: input, shape index: {}]   ;;  %s200_s2 = inlined_call_operand.vmem [shape: f32[1,2,1], index: 2, kind: output, shape index: {}]  }
   0x1   :  { %s20_s11 = sshll.u32 %s199_s1, 4  ;;  %s22_s13 = sshll.u32 %s149_s12, 4  ;;  %s21_s11 = int_to_ptr.hbm [resolvable:$true] %s20_s11  ;;  %s23_s13 = int_to_ptr.vmem [resolvable:$true] %s22_s13 }
   0x2   :  { %25 = dma.hbm_to_vmem [thread:$0]  %s21_s11, 256, %s23_s13, [#allocation4]  }
   0x3   :  { %147 = dma.done.wait [#allocation4], 256  }
   0x4   :  { %148 = vsyncadd [#allocation4], 4294967040  ;;  %vm36_vm0 = vcmask 1024   ;;  %v150_v0 = vmov 0.0   ;;  %v38_v1 = vld [vmem:[#allocation3] sm:$0xff]  ;;  %v39_v2 = vld [vmem:[#allocation3 + $0x8] sm:$0xff]  ;;  %v89_v28 = vstv %s198_s0 }
   0x5   :  { %37 = vst.msk [vmem:[%s200_s2] sm:$0x3] %vm36_vm0, %v150_v0  ;;  %v41_v3 = vmul.f32 %v38_v1, %v38_v1  ;;  %v42_v4 = vmul.f32 %v39_v2, %v39_v2  ;;  %vm64_vm1 = vcmask 1041408   ;;  %v91_v29 = vsub.f32 0.0, %v89_v28 }
   0x6   :  { %v90_v43 = vmax.f32 %v89_v28, 0.0 }
   0x7   :  { %45 = vst [vmem:[#allocation1] ss:$4 sm:$0xff] %v41_v3  ;;  %v94_v30 = vand.u32 2147483647, %v91_v29  ;;  %vm92_vm3 = vcmp.ne.f32.partialorder %v91_v29, %v91_v29 }
   0x8   :  { %47 = vst [vmem:[#allocation1 + $0x20] ss:$4 sm:$0xff] %v42_v4 }
   0x9   :  { %v95_v31 = vsub.f32 0.0, %v94_v30 }
   0xb   :  { %v96_v32 = vmul.f32 1.442695, %v95_v31 }
   0xc   :  { %v40_v41 = vld [vmem:[%s200_s2] sm:$0x3] }
   0xd   :  { %119 = vpow2.f32 %v96_v32 }
   0xe   :  { %v48_v5 = vld.sshfl [vmem:[#allocation1] sm:$0xff pattern:$0x73625140]  ;;  %v49_v6 = vld.sshfl [vmem:[#allocation1 + $0x8] sm:$0xff pattern:$0x73625140] }
   0xf   :  { %v50_v7 = vld.sshfl [vmem:[#allocation1 + $0x10] sm:$0xff pattern:$0x73625140]  ;;  %v51_v8 = vld.sshfl [vmem:[#allocation1 + $0x18] sm:$0xff pattern:$0x73625140] }
  0x10   :  { %v65_v9 = vsel %vm64_vm1, %v48_v5, 0.0  ;;  %v66_v10 = vsel %vm64_vm1, %v49_v6, 0.0  ;;  %v68_v11 = vsel %vm64_vm1, %v50_v7, 0.0  ;;  %v52_v12 = vld.sshfl [vmem:[#allocation1 + $0x20] sm:$0xff pattern:$0x73625140] }
  0x11   :  { %v67_v13 = vadd.f32 %v66_v10, %v65_v9  ;;  %v70_v14 = vsel %vm64_vm1, %v51_v8, 0.0  ;;  %v53_v15 = vld.sshfl [vmem:[#allocation1 + $0x28] sm:$0xff pattern:$0x73625140]  ;;  %v72_v17 = vsel %vm64_vm1, %v52_v12, 0.0 }
  0x12   :  { %v54_v18 = vld.sshfl [vmem:[#allocation1 + $0x30] sm:$0xff pattern:$0x73625140]  ;;  %v74_v20 = vsel %vm64_vm1, %v53_v15, 0.0 }
  0x13   :  { %v69_v16 = vadd.f32 %v68_v11, %v67_v13  ;;  %v55_v21 = vld.sshfl [vmem:[#allocation1 + $0x38] sm:$0xff pattern:$0x73625140]  ;;  %v76_v23 = vsel %vm64_vm1, %v54_v18, 0.0  ;;  %v120_v33 = vpop.eup %119 }
  0x14   :  { %v78_v25 = vsel %vm64_vm1, %v55_v21, 0.0  ;;  %v98_v34 = vadd.f32 1.0, %v120_v33  ;;  %v101_v35 = vmul.f32 -0.5, %v120_v33  ;;  %v104_v38 = vand.u32 2147483647, %v120_v33 }
  0x15   :  { %v71_v19 = vadd.f32 %v70_v14, %v69_v16 }
  0x16   :  { %121 = vlog2.f32 %v98_v34  ;;  %v102_v36 = vadd.f32 1.0, %v101_v35  ;;  %vm105_vm2 = vcmp.lt.f32.partialorder %v104_v38, 0.0004427343 }
  0x17   :  { %v73_v22 = vadd.f32 %v72_v17, %v71_v19 }
  0x18   :  { %v103_v40 = vmul.f32 %v120_v33, %v102_v36 }
  0x19   :  { %v75_v24 = vadd.f32 %v74_v20, %v73_v22 }
  0x1b   :  { %v77_v26 = vadd.f32 %v76_v23, %v75_v24 }
  0x1c   :  { %v122_v37 = vpop.eup %121 }
  0x1d   :  { %v79_v27 = vadd.f32 %v78_v25, %v77_v26  ;;  %v100_v39 = vmul.f32 0.6931472, %v122_v37 }
  0x1f   :  { %80 = vadd.xlane.f32.xlu0 %v79_v27  ;;  %v106_v45 = vsel %vm105_vm2, %v103_v40, %v100_v39 }
  0x20   :  { %v107_v46 = vadd.f32 %v106_v45, %v90_v43 }
  0x22   :  { %v108_v47 = vsel %vm92_vm3, %v89_v28, %v107_v46 }
  0x92   :  { %v81_v42 = vpop.xlane.xlu0 %80 }
  0x93   :  { %v82_v44 = vadd.f32 %v81_v42, %v40_v41 }
  0x95   :  { %84 = vst.msk [vmem:[%s200_s2] sm:$0x3] %vm36_vm0, %v82_v44 }
  0x9c   :  { %v109_v48 = vld [vmem:[%s200_s2] sm:$0x3] }
  0x9d   :  { %v110_v49 = vmul.f32 %v109_v48, %v108_v47 }
  0x9f   :  { %111 = vst.msk [vmem:[%s200_s2] sm:$0x3] %vm36_vm0, %v110_v49 }
  0xa0   :  { %116 = vsyncpa [#allocation4], 1 }

</bundles_post_ra>
